<compile_context>
chip_gen: v7x
topology: tpu7x:2x2x1
jax: 0.10.0
libtpu: 0.0.40
codegen_flags: <defaults>
</compile_context>

<pallas_src>
import jax
import jax.numpy as jnp
from jax.experimental import pallas as pl
from jax.experimental.pallas import tpu as pltpu


def _round_up(a: int, b: int) -> int:
    return (a + b - 1) // b * b


def _sublane_gran(dtype) -> int:
    # Sub-32-bit dtypes pack along sublanes; keep batch tiles a multiple of the
    # packed-tile height (f32/i32 -> 8, bf16 -> 16, int8 -> 32).
    return max(8, 32 // jnp.dtype(dtype).itemsize)


def _logp_kernel(x_ref, lp0_ref, lp1_ref, out_ref):
    # x_ref:   (TB, TN) int     spins in {0, 1}    (0 in the padded region)
    # lp*_ref: (TB, TN) float   log-prob of class 0 / 1 (0.0 in the padded region)
    # out_ref: (TB, 1)  float32 running per-row sum, accumulated over the k axis
    @pl.when(pl.program_id(1) == 0)
    def _init():
        out_ref[...] = jnp.zeros_like(out_ref)

    xf = x_ref[...].astype(jnp.float32)
    lp0 = lp0_ref[...].astype(jnp.float32)
    lp1 = lp1_ref[...].astype(jnp.float32)
    # sum(logp * one_hot(x, 2), axis=-1)  ==  lp0 where x == 0 else lp1
    sel = lp0 + xf * (lp1 - lp0)                              # (TB, TN)
    out_ref[...] += jnp.sum(sel, axis=-1, keepdims=True)      # (TB, 1)


def model_logp(x, logp, *, tb=None, tn=None):
    """x: (B, N) int in {0,1}; logp: (B, N, 2) float  ->  (B,) float32."""
    B, N = x.shape
    assert logp.shape == (B, N, 2), logp.shape

    # Split the tiny class axis into two lane-friendly (B, N) planes
    # (single fused multi-output pass over logp in XLA).
    lp0 = logp[..., 0]
    lp1 = logp[..., 1]

    # Tile sizes: lanes (natoms) in multiples of 128, sublanes (batch) in
    # multiples of the packed-tile height of the narrowest input dtype.
    gran = max(_sublane_gran(x.dtype), _sublane_gran(logp.dtype))
    if tn is None:
        tn = min(_round_up(N, 128), 2048)
    else:
        tn = _round_up(tn, 128)
    if tb is None:
        tb = min(_round_up(B, gran), 128)
    else:
        tb = _round_up(tb, gran)

    b_pad = _round_up(B, tb)
    n_pad = _round_up(N, tn)
    if b_pad != B or n_pad != N:
        pad = ((0, b_pad - B), (0, n_pad - N))
        x = jnp.pad(x, pad)        # padded spins = 0
        lp0 = jnp.pad(lp0, pad)    # padded log-probs = 0.0 -> contribute nothing
        lp1 = jnp.pad(lp1, pad)

    grid = (b_pad // tb, n_pad // tn)

    out = pl.pallas_call(
        _logp_kernel,
        out_shape=jax.ShapeDtypeStruct((b_pad, 1), jnp.float32),
        grid=grid,
        in_specs=[
            pl.BlockSpec((tb, tn), lambda i, k: (i, k)),
            pl.BlockSpec((tb, tn), lambda i, k: (i, k)),
            pl.BlockSpec((tb, tn), lambda i, k: (i, k)),
        ],
        out_specs=pl.BlockSpec((tb, 1), lambda i, k: (i, 0)),
        compiler_params=pltpu.CompilerParams(
            # batch tiles are independent (v7x: split over both TensorCores);
            # the natoms axis is the sequential reduction axis.
            dimension_semantics=("parallel", "arbitrary"),
            vmem_limit_bytes=32 * 1024 * 1024,
        ),
    )(x, lp0, lp1)
    return out[:B, 0]


if __name__ == "__main__":
    # Small lattice: Lx=25, Ly=10 -> natoms N = 250 (exercises the padding path).
    # Batch B = 48 with tb=32 / tn=128 -> grid (2, 2): exercises multi-tile batch
    # (parallel) and natoms (accumulator) axes.
    Lx, Ly = 25, 10
    N = Lx * Ly
    B = 48

    key = jax.random.PRNGKey(0)
    kx, kl = jax.random.split(key)

    # Spin configuration in {0, 1}; int8 keeps kernel-side x traffic at 1 B/site.
    x = jax.random.randint(kx, (B, N), minval=0, maxval=2, dtype=jnp.int8)
    # Synthesized output of forward(): normalized per-site log-probs (B, N, 2).
    logits = jax.random.normal(kl, (B, N, 2), dtype=jnp.float32)
    logp = jax.nn.log_softmax(logits, axis=-1)

    out = model_logp(x, logp, tb=32, tn=128)
    out = jax.block_until_ready(out)

    # Pure-JAX reference with the same semantics as Model.logp.
    ref = jnp.sum(logp * jax.nn.one_hot(x, 2, dtype=logp.dtype), axis=(-2, -1))
    assert out.shape == (B,)
    assert jnp.allclose(out, ref, atol=1e-5, rtol=1e-5), (out, ref)

    print("KERNEL_OK")
</pallas_src>

<mosaic_0001>
module attributes {stable_mosaic.version = 11 : i64} {
  func.func @_logp_kernel(%arg0: i32, %arg1: i32, %arg2: memref<32x128xi8, #tpu.memory_space<vmem>>, %arg3: memref<32x128xf32, #tpu.memory_space<vmem>>, %arg4: memref<32x128xf32, #tpu.memory_space<vmem>>, %arg5: memref<32x1xf32, #tpu.memory_space<vmem>>) attributes {dimension_semantics = [#tpu.dimension_semantics<parallel>, #tpu.dimension_semantics<arbitrary>], iteration_bounds = array<i64: 2, 2>, scalar_prefetch = 0 : i64, scratch_operands = 0 : i64, tpu.core_type = #tpu.core_type<tc>, window_params = [{transform_indices = @transform_0, window_bounds = array<i64: 32, 128>}, {transform_indices = @transform_1, window_bounds = array<i64: 32, 128>}, {transform_indices = @transform_2, window_bounds = array<i64: 32, 128>}, {transform_indices = @transform_3, window_bounds = array<i64: 32, 1>}]} {
    %c0_i32 = arith.constant 0 : i32
    %0 = arith.cmpi eq, %arg1, %c0_i32 : i32
    %1 = arith.extui %0 : i1 to i32
    %c0_i32_0 = arith.constant 0 : i32
    %2 = arith.cmpi ne, %1, %c0_i32_0 : i32
    scf.if %2 {
      %cst_10 = arith.constant 0.000000e+00 : f32
      %15 = vector.broadcast %cst_10 : f32 to vector<32x1xf32>
      %c0_11 = arith.constant 0 : index
      %c0_12 = arith.constant 0 : index
      %16 = vector.load %arg5[%c0_11, %c0_12] : memref<32x1xf32, #tpu.memory_space<vmem>>, vector<32x1xf32>
      tpu.vector_store %arg5[%c0_11, %c0_12], %15 {strides = array<i32>} : memref<32x1xf32, #tpu.memory_space<vmem>>, vector<32x1xf32>,
    } else {
    }
    %c0 = arith.constant 0 : index
    %c0_1 = arith.constant 0 : index
    %3 = vector.load %arg2[%c0, %c0_1] : memref<32x128xi8, #tpu.memory_space<vmem>>, vector<32x128xi8>
    %4 = arith.sitofp %3 : vector<32x128xi8> to vector<32x128xf32>
    %c0_2 = arith.constant 0 : index
    %c0_3 = arith.constant 0 : index
    %5 = vector.load %arg3[%c0_2, %c0_3] : memref<32x128xf32, #tpu.memory_space<vmem>>, vector<32x128xf32>
    %c0_4 = arith.constant 0 : index
    %c0_5 = arith.constant 0 : index
    %6 = vector.load %arg4[%c0_4, %c0_5] : memref<32x128xf32, #tpu.memory_space<vmem>>, vector<32x128xf32>
    %7 = arith.subf %6, %5 : vector<32x128xf32>
    %8 = arith.mulf %4, %7 : vector<32x128xf32>
    %9 = arith.addf %5, %8 : vector<32x128xf32>
    %c0_6 = arith.constant 0 : index
    %c0_7 = arith.constant 0 : index
    %10 = vector.load %arg5[%c0_6, %c0_7] : memref<32x1xf32, #tpu.memory_space<vmem>>, vector<32x1xf32>
    %cst = arith.constant dense<0.000000e+00> : vector<32xf32>
    %11 = vector.multi_reduction <add>, %9, %cst [1] : vector<32x128xf32> to vector<32xf32>
    %12 = vector.shape_cast %11 : vector<32xf32> to vector<32x1xf32>
    %13 = arith.addf %10, %12 : vector<32x1xf32>
    %c0_8 = arith.constant 0 : index
    %c0_9 = arith.constant 0 : index
    %14 = vector.load %arg5[%c0_8, %c0_9] : memref<32x1xf32, #tpu.memory_space<vmem>>, vector<32x1xf32>
    tpu.vector_store %arg5[%c0_8, %c0_9], %13 {strides = array<i32>} : memref<32x1xf32, #tpu.memory_space<vmem>>, vector<32x1xf32>,
    return
  }
  func.func @transform_0(%arg0: i32, %arg1: i32) -> (i32, i32) {
    %c0_i32 = arith.constant 0 : i32
    return %arg0, %arg1 : i32, i32
  }
  func.func @transform_1(%arg0: i32, %arg1: i32) -> (i32, i32) {
    %c0_i32 = arith.constant 0 : i32
    return %arg0, %arg1 : i32, i32
  }
  func.func @transform_2(%arg0: i32, %arg1: i32) -> (i32, i32) {
    %c0_i32 = arith.constant 0 : i32
    return %arg0, %arg1 : i32, i32
  }
  func.func @transform_3(%arg0: i32, %arg1: i32) -> (i32, i32) {
    %c0_i32 = arith.constant 0 : i32
    %c0_i32_0 = arith.constant 0 : i32
    return %arg0, %c0_i32 : i32, i32
  }
}

</mosaic_0001>

<bundles_post_ra>
// kernel: tpu_custom_call.1
= control target key start
LH: loop header
LB: loop body
LE: loop exit
PB: predicated region body
PF: predicated region fallthrough
CT: control target
= control target key end

     0   :  { %s1032_s0 = inlined_call_operand.hbm [shape: s8[64,256], index: 0, kind: input, shape index: {}]   ;;  %s1033_s1 = inlined_call_operand.hbm [shape: f32[64,256], index: 1, kind: input, shape index: {}]   ;;  %s1034_s2 = inlined_call_operand.hbm [shape: f32[64,256], index: 2, kind: input, shape index: {}]   ;;  %s1035_s3 = inlined_call_operand.vmem [shape: f32[64,1], index: 3, kind: output, shape index: {}]  }
   0x1   :  { %1045 = sst [smem:[#allocation11_spill]] %s1033_s1 }
   0x2   :  { %8 = vsyncpa [#allocation3], 0 }
   0x3   :  { %10 = vsyncpa [#allocation3 + $0x1], 0 }
   0x4   :  { %11 = vsyncpa [#allocation5], 0 }
   0x5   :  { %13 = vsyncpa [#allocation5 + $0x1], 0  ;;  %s779_s12 = smov 0   ;;  %s781_s13 = smov 0  }
   0x6   :  { %s783_s14 = smov 0   ;;  %s785_s15 = smov 0  }
   0x7   :  { %s787_s16 = smov 0   ;;  %s789_s17 = smov 0  }
   0x8   :  { %s791_s18 = smov 0   ;;  %s793_s19 = smov 0  }
   0x9 LB: > { %s1036_s20 = sadd.s32 4294967295, %s750_s19   ;;  %s28_s21 = sadd.s32 1, %s742_s17  ;;  %s750_s19 = sphi %s793_s19, %s19_s19   ;;  %s746_s18 = sphi %s791_s18, %s1068_s18   ;;  %s742_s17 = sphi %s789_s17, %s1067_s17   ;;  %s738_s16 = sphi %s787_s16, %s1066_s16   ;;  %s734_s15 = sphi %s785_s15, %s1065_s15   ;;  %s730_s14 = sphi %s783_s14, %s1064_s14   ;;  %s726_s13 = sphi %s781_s13, %s1063_s13   ;;  %s722_s12 = sphi %s779_s12, %s1062_s12  }
   0xa   : > { %p29_p0 = scmp.ge.s32.totalorder %s28_s21, 2  ;;  %s31_s22 = sadd.s32 1, %s746_s18 }
   0xb   : > { %s40_s23 = sadd.s32 1, %s730_s14  ;;  %p47_p1 = scmp.ne.s32.totalorder %s730_s14, %s726_s13 }
   0xc   : > { %s1070_s21 = smov (%p29_p0, %s28_s21), 0  ;;  %s1072_s22 = smov (!%p29_p0, %s31_s22), %s746_s18 }
   0xd   : > { %1046 = sst [smem:[#allocation9_spill]] %s1070_s21  ;;  %s36_s24 = ssub.s32 %s742_s17, %s1070_s21 }
   0xe   : > { %p48_p2 = scmp.eq.s32.totalorder %s750_s19, 0  ;;  %p33_p3 = scmp.ge.s32.totalorder %s1072_s22, 2 }
   0xf   : > { %p53_p4 = scmp.ne.s32.totalorder %s726_s13, %s722_s12  ;;  %p54_p6 = scmp.eq.s32.totalorder %s1036_s20, 0 }
  0x10   : > { %p49_p5 = por %p48_p2, %p47_p1  ;;  %s1074_s22 = smov (%p33_p3, %s1072_s22), 0 }
  0x11   : > { %1047 = sst [smem:[#allocation10_spill]] %s1074_s22  ;;  %p834_p7 = por %p54_p6, %p53_p4 }
  0x12   : > { %s35_s26 = ssub.s32 %s746_s18, %s1074_s22  ;;  %p521_p8 = scmp.lt.s32.totalorder %s750_s19, 4 }
  0x13   : > { %s1048_s25 = scalar_select %p834_p7, 1, 0 }
  0x14   : > { %s37_s27 = sor.u32 %s36_s24, %s35_s26  ;;  %s842_s28 = sand.u32 1, %s730_s14  }
  0x15   : > { %p38_p9 = scmp.eq.s32.totalorder %s37_s27, 0  ;;  %p844_p10 = pnand %p521_p8, %p49_p5 }
  0x16   : > { %s179_s30 = sand.u32 1, %s750_s19   ;;  %s486_s4 = sshll.u32 %s842_s28, 5 }
  0x17   : > { %s1049_s29 = scalar_select %p844_p10, 1, 0 }
  0x18   : > { %s851_s5 = scalar_select %p38_p9, %s730_s14, %s40_s23  }
  0x19   : > { %s503_s6 = sshll.u32 %s746_s18, 3  ;;  %s183_s8 = scalar_lea.vmem [#allocation4], %s486_s4 }
  0x1a   : > { %s855_s7 = sadd.s32 %s742_s17, %s503_s6  ;;  %s192_s9 = sshll.u32 %s183_s8, 4  ;;  %s860_s9 = int_to_ptr.vmem [resolvable:$true] %s192_s9 }
  0x1b   : > { %s489_s10 = sshll.u32 %s855_s7, 7  ;;  %s1050_s1 = sld [smem:[#allocation11_spill]] }
  0x1c   : > { %s869_s23 = scalar_lea.sflag [#allocation5], %s179_s30  ;;  %p875_p12 = pneg %p844_p10 }
  0x21   : > { %s867_s24 = scalar_lea.hbm %s1050_s1, %s489_s10  ;;  %s595_s11 = scalar_lea.hbm %s1050_s1, 2048 }
  0x22   : > { %s590_s26 = scalar_lea.hbm %s867_s24, 512  ;;  %p596_p1 = scmp.lt.u32.totalorder %s867_s24, %s1050_s1 }
  0x23   : > { %p591_p11 = scmp.ne.s32.totalorder %s867_s24, %s590_s26  ;;  %p597_p2 = scmp.lt.u32.totalorder %s595_s11, %s590_s26 }
  0x24   : > { %p599_p4 = scmp.lt.u32.totalorder %s590_s26, %s867_s24 }
  0x25   : > { %p593_p13 = pnand %p875_p12, %p591_p11  ;;  %p598_p3 = por %p597_p2, %p596_p1 }
  0x27   : > { %p594_p0 = pneg %p593_p13  ;;  %p600_p5 = por %p599_p4, %p598_p3 }
  0x29   : > { %p601_p6 = pnand %p600_p5, %p594_p0 }
  0x2b   : > { %604 = shalt.err (!%p601_p6)
}
  0x2c   : > { %s605_s30 = scalar_lea.vmem %s860_s9, 512  ;;  %s752_s6 = smov [#allocation4]  }
  0x2d   : > { %p606_p8 = scmp.ne.s32.totalorder %s860_s9, %s605_s30  ;;  %s610_s8 = sshll.u32 %s752_s6, 4  ;;  %s611_s8 = int_to_ptr.vmem [resolvable:$false] %s610_s8 }
  0x2e   : > { %s612_s20 = scalar_lea.vmem %s611_s8, 1024  ;;  %p613_p13 = scmp.lt.s32.totalorder %s860_s9, %s611_s8 }
  0x2f   : > { %p608_p9 = pnand %p606_p8, %p875_p12  ;;  %p614_p7 = scmp.lt.s32.totalorder %s612_s20, %s605_s30 }
  0x31   : > { %p609_p11 = pneg %p608_p9  ;;  %p615_p1 = por %p614_p7, %p613_p13 }
  0x33   : > { %p616_p2 = pnand %p615_p1, %p609_p11 }
  0x35   : > { %619 = shalt.err (!%p616_p2)
}
  0x36   : > { %s1039_s26 = smov 256   ;;  %s1040_s11 = smov 128  }
  0x37   : > { %s1041_s12 = smov 8   ;;  %s907_s8 = scalar_lea.hbm %s1034_s2, %s489_s10 }
  0x38   : > { %517 = dma.hbm_to_vmem [thread:$0]  (!%p844_p10), %s867_s24, 512, %s860_s9, %s869_s23, %s1039_s26, %s1040_s11, %s1041_s12  }
  0x39   : > { %s206_s20 = scalar_lea.vmem [#allocation6], %s486_s4  ;;  %p494_p7 = scmp.ge.s32.totalorder %s750_s19, 1 }
  0x3a   : > { %s215_s1 = sshll.u32 %s206_s20, 4  ;;  %p223_p0 = scmp.lt.s32.totalorder %s750_s19, 5  ;;  %s912_s1 = int_to_ptr.vmem [resolvable:$true] %s215_s1 }
  0x3b   : > { %s483_s9 = sshll.u32 %s842_s28, 3  ;;  %s484_s7 = sshll.u32 %s746_s18, 1 }
  0x3c   : > { %p915_p3 = pnand %p494_p7, %p223_p0  ;;  %s168_s24 = sadd.s32 %s742_s17, %s484_s7 }
  0x3d   : > { %s485_s26 = sshll.u32 %s168_s24, 7  ;;  %s163_s30 = scalar_lea.vmem [#allocation2], %s483_s9 }
  0x3e   : > { %s1052_s22 = scalar_select %p915_p3, 1, 0 }
  0x3f   : > { %s172_s6 = sshll.u32 %s163_s30, 4  ;;  %s925_s4 = scalar_lea.hbm %s1032_s0, %s485_s26  ;;  %s173_s6 = int_to_ptr.vmem [resolvable:$true] %s172_s6 }
  0x40   : > { %s160_s20 = scalar_lea.sflag [#allocation3], %s842_s28  ;;  %s620_s12 = scalar_lea.hbm %s925_s4, 128 }
  0x41   : > { %p621_p4 = scmp.ne.s32.totalorder %s925_s4, %s620_s12  ;;  %s625_s9 = scalar_lea.hbm %s1032_s0, 512 }
  0x42   : > { %p626_p8 = scmp.lt.u32.totalorder %s925_s4, %s1032_s0  ;;  %p627_p9 = scmp.lt.u32.totalorder %s625_s9, %s620_s12 }
  0x43   : > { %p623_p5 = pnand %p621_p4, %p875_p12  ;;  %p629_p13 = scmp.lt.u32.totalorder %s620_s12, %s925_s4 }
  0x44   : > { %p628_p11 = por %p627_p9, %p626_p8 }
  0x45   : > { %p624_p6 = pneg %p623_p5 }
  0x46   : > { %p630_p1 = por %p629_p13, %p628_p11 }
  0x48   : > { %p631_p2 = pnand %p630_p1, %p624_p6 }
  0x4a   : > { %634 = shalt.err (!%p631_p2)
}
  0x4b   : > { %s635_s28 = scalar_lea.vmem %s173_s6, 128  ;;  %s756_s26 = smov [#allocation2]  }
  0x4c   : > { %p636_p7 = scmp.ne.s32.totalorder %s173_s6, %s635_s28  ;;  %s640_s11 = sshll.u32 %s756_s26, 4  ;;  %s641_s11 = int_to_ptr.vmem [resolvable:$false] %s640_s11 }
  0x4d   : > { %s642_s10 = scalar_lea.vmem %s641_s11, 256  ;;  %p643_p5 = scmp.lt.s32.totalorder %s173_s6, %s641_s11 }
  0x4e   : > { %p638_p0 = pnand %p636_p7, %p875_p12  ;;  %p644_p3 = scmp.lt.s32.totalorder %s642_s10, %s635_s28 }
  0x50   : > { %p639_p4 = pneg %p638_p0  ;;  %p645_p10 = por %p644_p3, %p643_p5 }
  0x52   : > { %p646_p8 = pnand %p645_p10, %p639_p4 }
  0x54   : > { %649 = shalt.err (!%p646_p8)
}
  0x55   : > { %p1053_p9 = scmp.ne.s32.totalorder %s1049_s29, 0  ;;  %s650_s21 = scalar_lea.hbm %s907_s8, 512 }
  0x56   : > { %p651_p6 = scmp.ne.s32.totalorder %s907_s8, %s650_s21  ;;  %s655_s24 = scalar_lea.hbm %s1034_s2, 2048 }
  0x57   : > { %514 = dma.hbm_to_vmem [thread:$0]  (!%p1053_p9), %s925_s4, 128, %s173_s6, %s160_s20  }
  0x58   : > { %p653_p11 = pnand %p651_p6, %p875_p12  ;;  %p656_p10 = scmp.lt.u32.totalorder %s907_s8, %s1034_s2 }
  0x59   : > { %p657_p3 = scmp.lt.u32.totalorder %s655_s24, %s650_s21  ;;  %p659_p2 = scmp.lt.u32.totalorder %s650_s21, %s907_s8 }
  0x5a   : > { %p654_p13 = pneg %p653_p11 }
  0x5b   : > { %p658_p1 = por %p657_p3, %p656_p10 }
  0x5d   : > { %p660_p7 = por %p659_p2, %p658_p1 }
  0x5f   : > { %p661_p0 = pnand %p660_p7, %p654_p13 }
  0x61   : > { %664 = shalt.err (!%p661_p0)
}
  0x62   : > { %s665_s6 = scalar_lea.vmem %s912_s1, 512  ;;  %s757_s4 = smov [#allocation6]  }
  0x63   : > { %p666_p4 = scmp.ne.s32.totalorder %s912_s1, %s665_s6  ;;  %s670_s20 = sshll.u32 %s757_s4, 4  ;;  %s671_s20 = int_to_ptr.vmem [resolvable:$false] %s670_s20 }
  0x64   : > { %s672_s28 = scalar_lea.vmem %s671_s20, 1024  ;;  %p673_p6 = scmp.lt.s32.totalorder %s912_s1, %s671_s20 }
  0x65   : > { %p668_p5 = pnand %p666_p4, %p875_p12  ;;  %p674_p11 = scmp.lt.s32.totalorder %s672_s28, %s665_s6 }
  0x67   : > { %p669_p8 = pneg %p668_p5  ;;  %p675_p10 = por %p674_p11, %p673_p6 }
  0x69   : > { %p676_p3 = pnand %p675_p10, %p669_p8 }
  0x6b   : > { %679 = shalt.err (!%p676_p3)
}
  0x6c   : > { %s1054_s26 = smov 8   ;;  %s1055_s11 = smov 128  }
  0x6d   : > { %s1056_s10 = smov 256   ;;  %p1057_p12 = scmp.ne.s32.totalorder %s1052_s22, 0 }
  0x6e   : > { %520 = dma.hbm_to_vmem [thread:$0]  (!%p1053_p9), %s907_s8, 512, %s912_s1, %s869_s23, %s1056_s10, %s1055_s11, %s1054_s26  }
  0x6f   : > { %227 = sbr.rel (%p1057_p12) target bundleno = 291 (0x123), region = 32  ;;  %s229_s27 = sand.u32 (!%p1057_p12), 1, %s726_s13  }
  0x70   : > { %s495_s21 = sshll.u32 (!%p1057_p12), %s229_s27, 3  ;;  %s230_s12 = scalar_lea.sflag (!%p1057_p12), [#allocation3], %s229_s27 }
  0x71   : > { %s233_s7 = scalar_lea.vmem (!%p1057_p12), [#allocation2], %s495_s21  ;;  %p1058_p13 = scmp.ne.s32.totalorder (!%p1057_p12), %s1048_s25, 0 }
  0x76   : > { %713 = dma.done.wait (%p1058_p13), %s230_s12, 128  }
  0x77   : > { %715 = vsyncadd (%p1058_p13), %s230_s12, 4294967168  ;;  %s1059_s29 = sadd.s32 4294967295, %s750_s19   ;;  %s496_s9 = sshll.u32 %s229_s27, 5 }
  0x78   : > { %s238_s24 = sand.u32 1, %s1059_s29   ;;  %s979_s23 = scalar_lea.vmem [#allocation4], %s496_s9 }
  0x79   : > { %s239_s1 = scalar_lea.sflag [#allocation5], %s238_s24 }
  0x7a   : > { %717 = dma.done.wait (%p1058_p13), %s239_s1, 1024  }
  0x7b   : > { %719 = vsyncadd (%p1058_p13), %s239_s1, 4294966272  ;;  %s498_s22 = sshll.u32 %s738_s16, 2  ;;  %s251_s20 = scalar_lea.vmem [#allocation6], %s496_s9 }
  0x7c   : > { %p287_p9 = scmp.lt.s32.totalorder %s498_s22, 7  ;;  %p500_p1 = scmp.ne.s32.totalorder %s734_s15, 0 }
  0x7d   : > { %vm296_vm0 = vcmask (!%p500_p1), 7168   ;;  %v758_v0 = vmov (!%p500_p1), 0.0  }
  0x7e   : > { %s1076_s22 = smov (!%p287_p9, %s498_s22), 7  ;;  %295 = sbr.rel (%p500_p1) target bundleno = 133 (0x85), region = 48 }
  0x7f   : > { %s499_s8 = sshll.u32 %s1076_s22, 3 }
  0x80   : > { %s989_s4 = scalar_lea.vmem %s1035_s3, %s499_s8 }
  0x81   : > { %297 = vst.msk [vmem:[%s989_s4] sm:$0xff] (!%p500_p1), %vm296_vm0, %v758_v0  ;;  %298 = vst.msk [vmem:[%s989_s4 + $0x8] sm:$0xff] (!%p500_p1), %vm296_vm0, %v758_v0 }
  0x82   : > { %299 = vst.msk [vmem:[%s989_s4 + $0x10] sm:$0xff] (!%p500_p1), %vm296_vm0, %v758_v0  ;;  %300 = vst.msk [vmem:[%s989_s4 + $0x18] sm:$0xff] (!%p500_p1), %vm296_vm0, %v758_v0 }
  0x85 PF: > { %v301_v1 = vld [vmem:[%s233_s7] sm:$0xff]  ;;  %v310_v2 = vld [vmem:[%s979_s23] sm:$0xff]  ;;  %v311_v10 = vld [vmem:[%s979_s23 + $0x8] sm:$0xff]  ;;  %vm346_vm1 = vcmask 7168  }
  0x86   : > { %v314_v3 = vld [vmem:[%s251_s20] sm:$0xff]  ;;  %v302_v4 = vunpack.c.0.s8 %v301_v1  ;;  %v304_v6 = vunpack.c.2.s8 %v301_v1  ;;  %v312_v7 = vld [vmem:[%s979_s23 + $0x10] sm:$0xff]  ;;  %v303_v9 = vunpack.c.1.s8 %v301_v1  ;;  %v315_v12 = vld [vmem:[%s251_s20 + $0x8] sm:$0xff]  ;;  %v305_v13 = vunpack.c.3.s8 %v301_v1 }
  0x87   : > { %v318_v5 = vsub.f32 %v314_v3, %v310_v2  ;;  %v316_v8 = vld [vmem:[%s251_s20 + $0x10] sm:$0xff]  ;;  %v313_v14 = vld [vmem:[%s979_s23 + $0x18] sm:$0xff]  ;;  %v319_v19 = vsub.f32 %v315_v12, %v311_v10 }
  0x88   : > { %v320_v11 = vsub.f32 %v316_v8, %v312_v7  ;;  %v317_v15 = vld [vmem:[%s251_s20 + $0x18] sm:$0xff]  ;;  %v306_v16 = vcvt.s32.f32 %v302_v4  ;;  %v308_v17 = vcvt.s32.f32 %v304_v6  ;;  %v307_v18 = vcvt.s32.f32 %v303_v9  ;;  %v330_v30 = vld [vmem:[%s989_s4] sm:$0xff] }
  0x89   : > { %v309_v20 = vcvt.s32.f32 %v305_v13  ;;  %v321_v21 = vsub.f32 %v317_v15, %v313_v14  ;;  %v332_v32 = vld [vmem:[%s989_s4 + $0x10] sm:$0xff]  ;;  %v331_v34 = vld [vmem:[%s989_s4 + $0x8] sm:$0xff]  ;;  %v333_v35 = vld [vmem:[%s989_s4 + $0x18] sm:$0xff] }
  0x8a   : > { %v322_v22 = vmul.f32 %v318_v5, %v306_v16  ;;  %v324_v23 = vmul.f32 %v320_v11, %v308_v17  ;;  %v323_v24 = vmul.f32 %v319_v19, %v307_v18 }
  0x8b   : > { %v325_v25 = vmul.f32 %v321_v21, %v309_v20 }
  0x8c   : > { %v326_v26 = vadd.f32 %v322_v22, %v310_v2  ;;  %v328_v27 = vadd.f32 %v324_v23, %v312_v7  ;;  %v327_v28 = vadd.f32 %v323_v24, %v311_v10 }
  0x8d   : > { %v329_v29 = vadd.f32 %v325_v25, %v313_v14 }
  0x8e   : > { %334 = vadd.xlane.f32.xlu0 %v326_v26  ;;  %338 = vadd.xlane.f32.xlu1 %v328_v27 }
  0x92   : > { %336 = vadd.xlane.f32.xlu0 %v327_v28  ;;  %340 = vadd.xlane.f32.xlu1 %v329_v29 }
 0x11b   : > { %v335_v31 = vpop.xlane.xlu0 %334  ;;  %v339_v33 = vpop.xlane.xlu1 %338 }
 0x11c   : > { %v342_v36 = vadd.f32 %v335_v31, %v330_v30  ;;  %v344_v41 = vadd.f32 %v339_v33, %v332_v32 }
 0x11e   : > { %347 = vst.msk [vmem:[%s989_s4] sm:$0xff] %vm346_vm1, %v342_v36  ;;  %349 = vst.msk [vmem:[%s989_s4 + $0x10] sm:$0xff] %vm346_vm1, %v344_v41 }
 0x11f   : > { %v337_v37 = vpop.xlane.xlu0 %336  ;;  %v341_v38 = vpop.xlane.xlu1 %340 }
 0x120   : > { %v343_v39 = vadd.f32 %v337_v37, %v331_v34  ;;  %v345_v40 = vadd.f32 %v341_v38, %v333_v35 }
 0x122   : > { %348 = vst.msk [vmem:[%s989_s4 + $0x8] sm:$0xff] %vm346_vm1, %v343_v39  ;;  %350 = vst.msk [vmem:[%s989_s4 + $0x18] sm:$0xff] %vm346_vm1, %v345_v40 }
 0x123 PF: > { %s19_s19 = sadd.s32 1, %s750_s19   ;;  %s1060_s25 = sld [smem:[#allocation9_spill]] }
 0x124   : > { %p16_p2 = scmp.ge.s32.totalorder %s19_s19, 6   ;;  %s1061_s28 = sld [smem:[#allocation10_spill]] }
 0x125   : > { %s1062_s12 = smov %s726_s13  ;;  %s1063_s13 = smov %s730_s14 }
 0x126   : > { %s1064_s14 = smov %s851_s5  ;;  %s1065_s15 = smov %s742_s17 }
 0x127   : > { %s1066_s16 = smov %s746_s18  ;;  %18 = sbr.rel (!%p16_p2) target bundleno = 9 (0x9), region = 100 }
 0x129   : > { %s1067_s17 = smov %s1060_s25 }
 0x12a   : > { %s1068_s18 = smov %s1061_s28 }
 0x12e   :  { %373 = vsyncpa [#allocation3], 1 }
 0x12f   :  { %375 = vsyncpa [#allocation3 + $0x1], 1 }
 0x130   :  { %376 = vsyncpa [#allocation5], 1 }
 0x131   :  { %378 = vsyncpa [#allocation5 + $0x1], 1 }

</bundles_post_ra>
